<compile_context>
chip_gen: v7x
topology: tpu7x:2x2x1
jax: 0.10.0
libtpu: 0.0.40
codegen_flags: <defaults>
</compile_context>

<pallas_src>
import functools

import jax
import jax.numpy as jnp
import numpy as np
from jax.experimental import pallas as pl
from jax.experimental.pallas import tpu as pltpu


def _round_up(v, m):
    return -(-v // m) * m


def _softplus(z):
    # torch.nn.functional.softplus (beta=1), numerically stable.
    return jnp.maximum(z, 0.0) + jnp.log(1.0 + jnp.exp(-jnp.abs(z)))


def _fused_kernel(x_ref, w1_ref, b1_ref, s1_ref, t1_ref,
                  w2_ref, b2_ref, s2_ref, t2_ref, wl_ref, bl_ref,
                  o_ref, xpad_ref, hpad_ref,
                  *, n, tt, f, pad, hidden, xa, fuse2):
    """Fused dur+sigma predictor for one (batch, time-tile) grid step.

    x_ref    : (1, N, C_in)            unpadded input
    w1_ref   : (f, C_in, 2H)           conv#1 taps, out-channels = [dur | sigma]
    b1/s1/t1 : (1, 2H)                 conv#1 bias + folded eval-BN affine
    w2_ref   : (f, 2H, 2H) block-diag  (fuse2) or (2f, H, H) per-branch taps
    b2/s2/t2 : (1, 2H)
    wl_ref   : (2, 2H) (fuse2) or (2, H); row 0 = dur, row 1 = sigma
    bl_ref   : (2, 1)
    o_ref    : (1, 2, TT)              lane-dense output (time on lanes)
    xpad_ref : (N_padded + 2*xa, C_in) zero-padded input scratch
    hpad_ref : (>= TT + 2*pad, 2H)     per-tile hidden scratch (incl. halo)
    """
    c_in = x_ref.shape[2]
    tte = tt + 2 * pad                      # hidden rows needed for this tile
    ti = pl.program_id(1)
    t0 = ti * tt                            # first output row of this tile

    # --- refresh the zero-padded input scratch once per batch element --------
    # Only the halo / tail rows are zeroed; the interior is fully overwritten
    # here and the halo rows are never written anywhere else.
    @pl.when(ti == 0)
    def _():
        tail = xpad_ref.shape[0] - xa - n
        xpad_ref[pl.ds(0, xa), :] = jnp.zeros((xa, c_in), jnp.float32)
        xpad_ref[pl.ds(xa + n, tail), :] = jnp.zeros((tail, c_in), jnp.float32)
        xpad_ref[pl.ds(xa, n), :] = x_ref[0]

    # --- Conv1DBlock #1 (fused 2H output channels): Conv1d -> ReLU -> BN -----
    # Produces hidden rows [t0 - pad, t0 + tt + pad) so conv#2 is tile-local.
    base = xa + t0 - 2 * pad
    acc1 = jnp.zeros((tte, 2 * hidden), jnp.float32)
    for k in range(f):                       # static, unrolled taps
        acc1 = acc1 + jnp.dot(xpad_ref[pl.ds(base + k, tte), :], w1_ref[k],
                              preferred_element_type=jnp.float32)
    y1 = jnp.maximum(acc1 + b1_ref[...], 0.0) * s1_ref[...] + t1_ref[...]
    # Zero rows outside [0, n): realizes conv#2's zero "same"-padding and
    # neutralizes the tail of the last (partial) time tile (BN shift would
    # otherwise make out-of-range rows non-zero).
    row = jax.lax.broadcasted_iota(jnp.int32, (tte, 1), 0) + (t0 - pad)
    y1 = jnp.where(jnp.logical_and(row >= 0, row < n), y1, 0.0)
    hpad_ref[pl.ds(0, tte), :] = y1
    # dropout: identity in eval mode

    # --- Conv1DBlock #2 + Linear heads + softplus -----------------------------
    if fuse2:
        # Block-diagonal fused stage 2: both branches in one set of dots.
        hh = 2 * hidden
        acc2 = jnp.zeros((tt, hh), jnp.float32)
        for k in range(f):
            acc2 = acc2 + jnp.dot(hpad_ref[pl.ds(k, tt), :], w2_ref[k],
                                  preferred_element_type=jnp.float32)
        y2 = jnp.maximum(acc2 + b2_ref[...], 0.0) * s2_ref[...] + t2_ref[...]
        # Two linear heads as one NT dot -> [2, TT] lane-major result.
        lin2 = jax.lax.dot_general(wl_ref[...], y2, (((1,), (1,)), ((), ())),
                                   preferred_element_type=jnp.float32)
        lin2 = lin2 + bl_ref[...]
    else:
        outs = []
        for br in range(2):                  # 0 = duration, 1 = sigma
            lo = br * hidden                 # static lane offset
            acc2 = jnp.zeros((tt, hidden), jnp.float32)
            for k in range(f):
                acc2 = acc2 + jnp.dot(
                    hpad_ref[pl.ds(k, tt), pl.ds(lo, hidden)],
                    w2_ref[br * f + k],
                    preferred_element_type=jnp.float32)
            y2 = (jnp.maximum(acc2 + b2_ref[:, pl.ds(lo, hidden)], 0.0)
                  * s2_ref[:, pl.ds(lo, hidden)] + t2_ref[:, pl.ds(lo, hidden)])
            lin = jax.lax.dot_general(wl_ref[br:br + 1, :], y2,
                                      (((1,), (1,)), ((), ())),
                                      preferred_element_type=jnp.float32)
            outs.append(lin)
        lin2 = jnp.concatenate(outs, axis=0) + bl_ref[...]    # [2, TT]

    o_ref[0] = _softplus(lin2).astype(o_ref.dtype)


def _fuse_params(params, fuse2):
    pd, ps = params["dur"], params["sigma"]
    hidden = pd["wl"].shape[1]
    f = pd["w1"].shape[0]
    w1 = jnp.concatenate([pd["w1"], ps["w1"]], axis=2)     # [f, C_in, 2H]
    b1 = jnp.concatenate([pd["b1"], ps["b1"]], axis=1)     # [1, 2H]
    s1 = jnp.concatenate([pd["s1"], ps["s1"]], axis=1)
    t1 = jnp.concatenate([pd["t1"], ps["t1"]], axis=1)
    b2 = jnp.concatenate([pd["b2"], ps["b2"]], axis=1)
    s2 = jnp.concatenate([pd["s2"], ps["s2"]], axis=1)
    t2 = jnp.concatenate([pd["t2"], ps["t2"]], axis=1)
    bl = jnp.concatenate([pd["bl"], ps["bl"]], axis=0)      # [2, 1]
    if fuse2:
        zf = jnp.zeros((f, hidden, hidden), jnp.float32)
        w2 = jnp.concatenate(
            [jnp.concatenate([pd["w2"], zf], axis=2),
             jnp.concatenate([zf, ps["w2"]], axis=2)], axis=1)  # [f, 2H, 2H]
        zh = jnp.zeros((1, hidden), jnp.float32)
        wl = jnp.concatenate(
            [jnp.concatenate([pd["wl"], zh], axis=1),
             jnp.concatenate([zh, ps["wl"]], axis=1)], axis=0)  # [2, 2H]
    else:
        w2 = jnp.concatenate([pd["w2"], ps["w2"]], axis=0)      # [2f, H, H]
        wl = jnp.concatenate([pd["wl"], ps["wl"]], axis=0)      # [2, H]
    return w1, b1, s1, t1, w2, b2, s2, t2, wl, bl


def conv_duration_sigma_predictor(x, params, *, time_tile=256):
    """x: [B, N, in_size] -> (dur [B, N], sigma [B, N]); all float32."""
    x = x.astype(jnp.float32)
    b, n, c_in = x.shape
    hidden = params["dur"]["wl"].shape[1]
    f = params["dur"]["w1"].shape[0]
    pad = f // 2
    hh = 2 * hidden
    # Fuse stage 2 into block-diagonal weights only when it costs no extra
    # MXU lanes (2H <= 128); for larger hidden sizes keep per-branch dots.
    fuse2 = hh <= 128
    w1, b1, s1, t1, w2, b2, s2, t2, wl, bl = _fuse_params(params, fuse2)

    # NOTE: conv/matmul inputs could be cast to bf16 (f32 accumulate) for MXU
    # throughput / bandwidth; kept f32 here to match the f32 reference.
    assert time_tile % 128 == 0
    n8 = _round_up(n, 8)
    if n8 <= time_tile:
        tt, n_tiles = n8, 1
    else:
        tt, n_tiles = time_tile, -(-n // time_tile)
    n_padded = n_tiles * tt

    xa = max(8, _round_up(2 * pad, 8))               # aligned left halo >= 2*pad
    xpad_rows = n_padded + 2 * xa
    hpad_rows = _round_up(tt + 2 * pad, 8)

    kernel = functools.partial(_fused_kernel, n=n, tt=tt, f=f, pad=pad,
                               hidden=hidden, xa=xa, fuse2=fuse2)

    out = pl.pallas_call(
        kernel,
        out_shape=jax.ShapeDtypeStruct((b, 2, n_padded), jnp.float32),
        grid=(b, n_tiles),
        in_specs=[
            pl.BlockSpec((1, n, c_in), lambda bi, ti: (bi, 0, 0)),
            pl.BlockSpec(w1.shape, lambda bi, ti: (0, 0, 0)),
            pl.BlockSpec(b1.shape, lambda bi, ti: (0, 0)),
            pl.BlockSpec(s1.shape, lambda bi, ti: (0, 0)),
            pl.BlockSpec(t1.shape, lambda bi, ti: (0, 0)),
            pl.BlockSpec(w2.shape, lambda bi, ti: (0, 0, 0)),
            pl.BlockSpec(b2.shape, lambda bi, ti: (0, 0)),
            pl.BlockSpec(s2.shape, lambda bi, ti: (0, 0)),
            pl.BlockSpec(t2.shape, lambda bi, ti: (0, 0)),
            pl.BlockSpec(wl.shape, lambda bi, ti: (0, 0)),
            pl.BlockSpec(bl.shape, lambda bi, ti: (0, 0)),
        ],
        out_specs=pl.BlockSpec((1, 2, tt), lambda bi, ti: (bi, 0, ti)),
        scratch_shapes=[pltpu.VMEM((xpad_rows, c_in), jnp.float32),
                        pltpu.VMEM((hpad_rows, hh), jnp.float32)],
        compiler_params=pltpu.CompilerParams(
            dimension_semantics=("parallel", "arbitrary")),
    )(x, w1, b1, s1, t1, w2, b2, s2, t2, wl, bl)

    return out[:, 0, :n], out[:, 1, :n]


# ----------------------- deterministic parameter init -----------------------

def init_params(key, in_size, hidden, filter_size, eps=1e-5):
    def xavier_conv(k, cin, cout):
        # torch Conv1d weight [cout, cin, f] with xavier_normal_
        fan_in, fan_out = cin * filter_size, cout * filter_size
        std = float(np.sqrt(2.0 / (fan_in + fan_out)))
        w = jax.random.normal(k, (cout, cin, filter_size), jnp.float32) * std
        return jnp.transpose(w, (2, 1, 0))  # -> [f, cin, cout]

    def conv_bias(k, cin, cout):
        bound = 1.0 / float(np.sqrt(cin * filter_size))
        return jax.random.uniform(k, (1, cout), jnp.float32, -bound, bound)

    def bn_affine(cout):
        gamma = jnp.ones((1, cout), jnp.float32)
        beta = jnp.zeros((1, cout), jnp.float32)
        r_mean = jnp.zeros((1, cout), jnp.float32)
        r_var = jnp.ones((1, cout), jnp.float32)
        scale = gamma / jnp.sqrt(r_var + eps)
        shift = beta - r_mean * scale
        return scale, shift

    def linear(k):
        k1, k2 = jax.random.split(k)
        bound = 1.0 / float(np.sqrt(hidden))
        wl = jax.random.uniform(k1, (1, hidden), jnp.float32, -bound, bound)
        bl = jax.random.uniform(k2, (1, 1), jnp.float32, -bound, bound)
        return wl, bl

    def branch(k):
        ks = jax.random.split(k, 5)
        w1 = xavier_conv(ks[0], in_size, hidden)
        b1 = conv_bias(ks[1], in_size, hidden)
        s1, t1 = bn_affine(hidden)
        w2 = xavier_conv(ks[2], hidden, hidden)
        b2 = conv_bias(ks[3], hidden, hidden)
        s2, t2 = bn_affine(hidden)
        wl, bl = linear(ks[4])
        return dict(w1=w1, b1=b1, s1=s1, t1=t1,
                    w2=w2, b2=b2, s2=s2, t2=t2, wl=wl, bl=bl)

    k_dur, k_sig = jax.random.split(key)
    return {"dur": branch(k_dur), "sigma": branch(k_sig)}


# ----------------------------- pure-JAX reference ----------------------------

def _ref_branch(x, p):
    f = p["w1"].shape[0]
    pad = f // 2
    n = x.shape[1]

    def block(inp, w, b, s, t):
        xp = jnp.pad(inp, ((0, 0), (pad, pad), (0, 0)))
        out = sum(jnp.einsum("btc,co->bto", xp[:, k:k + n, :], w[k])
                  for k in range(f)) + b[0]
        return jnp.maximum(out, 0.0) * s[0] + t[0]

    h = block(x, p["w1"], p["b1"], p["s1"], p["t1"])
    h = block(h, p["w2"], p["b2"], p["s2"], p["t2"])
    lin = jnp.einsum("bth,h->bt", h, p["wl"][0]) + p["bl"][0, 0]
    return _softplus(lin)


def _check(x, params, **kw):
    dur, sigma = conv_duration_sigma_predictor(x, params, **kw)
    jax.block_until_ready((dur, sigma))
    b, n = x.shape[0], x.shape[1]
    assert dur.shape == (b, n) and sigma.shape == (b, n)
    ref_dur = _ref_branch(x, params["dur"])
    ref_sig = _ref_branch(x, params["sigma"])
    np.testing.assert_allclose(np.asarray(dur), np.asarray(ref_dur),
                               rtol=1e-4, atol=5e-5)
    np.testing.assert_allclose(np.asarray(sigma), np.asarray(ref_sig),
                               rtol=1e-4, atol=5e-5)


if __name__ == "__main__":
    key = jax.random.PRNGKey(0)
    kx1, kp1, kx2, kp2 = jax.random.split(key, 4)

    # Config A: small hidden (2H <= 128) -> fused block-diagonal stage 2,
    # single time tile.
    B, N, IN_SIZE, HIDDEN, FILTER = 2, 16, 8, 32, 3
    x1 = jax.random.normal(kx1, (B, N, IN_SIZE), jnp.float32)
    p1 = init_params(kp1, IN_SIZE, HIDDEN, FILTER)
    _check(x1, p1)

    # Config B: larger hidden (2H > 128) -> per-branch stage 2, multiple time
    # tiles (exercises the halo / tail-masking path) and filter_size = 5.
    B2, N2, IN2, HID2, FILT2 = 2, 200, 8, 128, 5
    x2 = jax.random.normal(kx2, (B2, N2, IN2), jnp.float32)
    p2 = init_params(kp2, IN2, HID2, FILT2)
    _check(x2, p2, time_tile=128)

    print("KERNEL_OK")
</pallas_src>

<mosaic_0001>
module attributes {stable_mosaic.version = 11 : i64} {
  func.func @_fused_kernel(%arg0: i32, %arg1: i32, %arg2: memref<1x16x8xf32, #tpu.memory_space<vmem>>, %arg3: memref<3x8x64xf32, #tpu.memory_space<vmem>>, %arg4: memref<1x64xf32, #tpu.memory_space<vmem>>, %arg5: memref<1x64xf32, #tpu.memory_space<vmem>>, %arg6: memref<1x64xf32, #tpu.memory_space<vmem>>, %arg7: memref<3x64x64xf32, #tpu.memory_space<vmem>>, %arg8: memref<1x64xf32, #tpu.memory_space<vmem>>, %arg9: memref<1x64xf32, #tpu.memory_space<vmem>>, %arg10: memref<1x64xf32, #tpu.memory_space<vmem>>, %arg11: memref<2x64xf32, #tpu.memory_space<vmem>>, %arg12: memref<2x1xf32, #tpu.memory_space<vmem>>, %arg13: memref<1x2x16xf32, #tpu.memory_space<vmem>>, %arg14: memref<32x8xf32, #tpu.memory_space<vmem>>, %arg15: memref<24x64xf32, #tpu.memory_space<vmem>>) attributes {dimension_semantics = [#tpu.dimension_semantics<parallel>, #tpu.dimension_semantics<arbitrary>], iteration_bounds = array<i64: 2, 1>, scalar_prefetch = 0 : i64, scratch_operands = 2 : i64, tpu.core_type = #tpu.core_type<tc>, window_params = [{transform_indices = @transform_0, window_bounds = array<i64: 1, 16, 8>}, {pipeline_mode = #tpu.pipeline_mode<synchronous>, transform_indices = @transform_1, window_bounds = array<i64: 3, 8, 64>}, {pipeline_mode = #tpu.pipeline_mode<synchronous>, transform_indices = @transform_2, window_bounds = array<i64: 1, 64>}, {pipeline_mode = #tpu.pipeline_mode<synchronous>, transform_indices = @transform_3, window_bounds = array<i64: 1, 64>}, {pipeline_mode = #tpu.pipeline_mode<synchronous>, transform_indices = @transform_4, window_bounds = array<i64: 1, 64>}, {pipeline_mode = #tpu.pipeline_mode<synchronous>, transform_indices = @transform_5, window_bounds = array<i64: 3, 64, 64>}, {pipeline_mode = #tpu.pipeline_mode<synchronous>, transform_indices = @transform_6, window_bounds = array<i64: 1, 64>}, {pipeline_mode = #tpu.pipeline_mode<synchronous>, transform_indices = @transform_7, window_bounds = array<i64: 1, 64>}, {pipeline_mode = #tpu.pipeline_mode<synchronous>, transform_indices = @transform_8, window_bounds = array<i64: 1, 64>}, {pipeline_mode = #tpu.pipeline_mode<synchronous>, transform_indices = @transform_9, window_bounds = array<i64: 2, 64>}, {pipeline_mode = #tpu.pipeline_mode<synchronous>, transform_indices = @transform_10, window_bounds = array<i64: 2, 1>}, {transform_indices = @transform_11, window_bounds = array<i64: 1, 2, 16>}]} {
    %c16_i32 = arith.constant 16 : i32
    %0 = arith.muli %arg1, %c16_i32 : i32
    %c0_i32 = arith.constant 0 : i32
    %1 = arith.cmpi eq, %arg1, %c0_i32 : i32
    %2 = arith.extui %1 : i1 to i32
    %c0_i32_0 = arith.constant 0 : i32
    %3 = arith.cmpi ne, %2, %c0_i32_0 : i32
    scf.if %3 {
      %cst_65 = arith.constant 0.000000e+00 : f32
      %98 = vector.broadcast %cst_65 : f32 to vector<8x8xf32>
      %c0_66 = arith.constant 0 : index
      %c0_67 = arith.constant 0 : index
      %99 = vector.load %arg14[%c0_66, %c0_67] : memref<32x8xf32, #tpu.memory_space<vmem>>, vector<8x8xf32>
      tpu.vector_store %arg14[%c0_66, %c0_67], %98 {strides = array<i32>} : memref<32x8xf32, #tpu.memory_space<vmem>>, vector<8x8xf32>,
      %cst_68 = arith.constant 0.000000e+00 : f32
      %100 = vector.broadcast %cst_68 : f32 to vector<8x8xf32>
      %c24 = arith.constant 24 : index
      %c0_69 = arith.constant 0 : index
      %101 = vector.load %arg14[%c24, %c0_69] : memref<32x8xf32, #tpu.memory_space<vmem>>, vector<8x8xf32>
      tpu.vector_store %arg14[%c24, %c0_69], %100 {strides = array<i32>} : memref<32x8xf32, #tpu.memory_space<vmem>>, vector<8x8xf32>,
      %c0_70 = arith.constant 0 : index
      %c0_71 = arith.constant 0 : index
      %c0_72 = arith.constant 0 : index
      %102 = vector.load %arg2[%c0_70, %c0_71, %c0_72] : memref<1x16x8xf32, #tpu.memory_space<vmem>>, vector<1x16x8xf32>
      %103 = vector.shape_cast %102 : vector<1x16x8xf32> to vector<16x8xf32>
      %c8 = arith.constant 8 : index
      %c0_73 = arith.constant 0 : index
      %104 = vector.load %arg14[%c8, %c0_73] : memref<32x8xf32, #tpu.memory_space<vmem>>, vector<16x8xf32>
      tpu.vector_store %arg14[%c8, %c0_73], %103 {strides = array<i32>} : memref<32x8xf32, #tpu.memory_space<vmem>>, vector<16x8xf32>,
    } else {
    }
    %c8_i32 = arith.constant 8 : i32
    %4 = arith.addi %c8_i32, %0 : i32
    %c2_i32 = arith.constant 2 : i32
    %5 = arith.subi %4, %c2_i32 : i32
    %cst = arith.constant 0.000000e+00 : f32
    %6 = vector.broadcast %cst : f32 to vector<18x64xf32>
    %c0_i32_1 = arith.constant 0 : i32
    %7 = arith.addi %5, %c0_i32_1 : i32
    %8 = arith.index_cast %7 : i32 to index
    %c0 = arith.constant 0 : index
    %9 = vector.load %arg14[%8, %c0] : memref<32x8xf32, #tpu.memory_space<vmem>>, vector<18x8xf32>
    %c0_2 = arith.constant 0 : index
    %c0_3 = arith.constant 0 : index
    %c0_4 = arith.constant 0 : index
    %10 = vector.load %arg3[%c0_2, %c0_3, %c0_4] : memref<3x8x64xf32, #tpu.memory_space<vmem>>, vector<1x8x64xf32>
    %11 = vector.shape_cast %10 : vector<1x8x64xf32> to vector<8x64xf32>
    %cst_5 = arith.constant dense<0.000000e+00> : vector<18x64xf32>
    %12 = tpu.matmul %9, %11, %cst_5 {dimension_numbers = #tpu.dot_dimension_numbers<[1], [0], [0], [1], [0, 0, 1, 1], [], []>} : vector<18x8xf32>, vector<8x64xf32>, vector<18x64xf32> -> vector<18x64xf32>
    %13 = arith.addf %6, %12 : vector<18x64xf32>
    %c1_i32 = arith.constant 1 : i32
    %14 = arith.addi %5, %c1_i32 : i32
    %15 = arith.index_cast %14 : i32 to index
    %c0_6 = arith.constant 0 : index
    %16 = vector.load %arg14[%15, %c0_6] : memref<32x8xf32, #tpu.memory_space<vmem>>, vector<18x8xf32>
    %c1 = arith.constant 1 : index
    %c0_7 = arith.constant 0 : index
    %c0_8 = arith.constant 0 : index
    %17 = vector.load %arg3[%c1, %c0_7, %c0_8] : memref<3x8x64xf32, #tpu.memory_space<vmem>>, vector<1x8x64xf32>
    %18 = vector.shape_cast %17 : vector<1x8x64xf32> to vector<8x64xf32>
    %cst_9 = arith.constant dense<0.000000e+00> : vector<18x64xf32>
    %19 = tpu.matmul %16, %18, %cst_9 {dimension_numbers = #tpu.dot_dimension_numbers<[1], [0], [0], [1], [0, 0, 1, 1], [], []>} : vector<18x8xf32>, vector<8x64xf32>, vector<18x64xf32> -> vector<18x64xf32>
    %20 = arith.addf %13, %19 : vector<18x64xf32>
    %c2_i32_10 = arith.constant 2 : i32
    %21 = arith.addi %5, %c2_i32_10 : i32
    %22 = arith.index_cast %21 : i32 to index
    %c0_11 = arith.constant 0 : index
    %23 = vector.load %arg14[%22, %c0_11] : memref<32x8xf32, #tpu.memory_space<vmem>>, vector<18x8xf32>
    %c2 = arith.constant 2 : index
    %c0_12 = arith.constant 0 : index
    %c0_13 = arith.constant 0 : index
    %24 = vector.load %arg3[%c2, %c0_12, %c0_13] : memref<3x8x64xf32, #tpu.memory_space<vmem>>, vector<1x8x64xf32>
    %25 = vector.shape_cast %24 : vector<1x8x64xf32> to vector<8x64xf32>
    %cst_14 = arith.constant dense<0.000000e+00> : vector<18x64xf32>
    %26 = tpu.matmul %23, %25, %cst_14 {dimension_numbers = #tpu.dot_dimension_numbers<[1], [0], [0], [1], [0, 0, 1, 1], [], []>} : vector<18x8xf32>, vector<8x64xf32>, vector<18x64xf32> -> vector<18x64xf32>
    %27 = arith.addf %20, %26 : vector<18x64xf32>
    %c0_15 = arith.constant 0 : index
    %c0_16 = arith.constant 0 : index
    %28 = vector.load %arg4[%c0_15, %c0_16] : memref<1x64xf32, #tpu.memory_space<vmem>>, vector<1x64xf32>
    %29 = vector.broadcast %28 : vector<1x64xf32> to vector<18x64xf32>
    %30 = arith.addf %27, %29 : vector<18x64xf32>
    %cst_17 = arith.constant 0.000000e+00 : f32
    %31 = vector.broadcast %cst_17 : f32 to vector<18x64xf32>
    %32 = arith.maximumf %30, %31 : vector<18x64xf32>
    %c0_18 = arith.constant 0 : index
    %c0_19 = arith.constant 0 : index
    %33 = vector.load %arg5[%c0_18, %c0_19] : memref<1x64xf32, #tpu.memory_space<vmem>>, vector<1x64xf32>
    %34 = vector.broadcast %33 : vector<1x64xf32> to vector<18x64xf32>
    %35 = arith.mulf %32, %34 : vector<18x64xf32>
    %c0_20 = arith.constant 0 : index
    %c0_21 = arith.constant 0 : index
    %36 = vector.load %arg6[%c0_20, %c0_21] : memref<1x64xf32, #tpu.memory_space<vmem>>, vector<1x64xf32>
    %37 = vector.broadcast %36 : vector<1x64xf32> to vector<18x64xf32>
    %38 = arith.addf %35, %37 : vector<18x64xf32>
    %39 = tpu.iota {dimensions = array<i32: 0>} : vector<18x1xi32>
    %c1_i32_22 = arith.constant 1 : i32
    %40 = arith.subi %0, %c1_i32_22 : i32
    %41 = vector.broadcast %40 : i32 to vector<18x1xi32>
    %42 = arith.addi %39, %41 : vector<18x1xi32>
    %c0_i32_23 = arith.constant 0 : i32
    %43 = vector.broadcast %c0_i32_23 : i32 to vector<18x1xi32>
    %44 = arith.cmpi sge, %42, %43 : vector<18x1xi32>
    %c16_i32_24 = arith.constant 16 : i32
    %45 = vector.broadcast %c16_i32_24 : i32 to vector<18x1xi32>
    %46 = arith.cmpi slt, %42, %45 : vector<18x1xi32>
    %47 = arith.andi %44, %46 : vector<18x1xi1>
    %cst_25 = arith.constant 0.000000e+00 : f32
    %48 = vector.shape_cast %47 : vector<18x1xi1> to vector<18x1xi1>
    %49 = vector.broadcast %48 : vector<18x1xi1> to vector<18x64xi1>
    %50 = vector.broadcast %cst_25 : f32 to vector<18x64xf32>
    %51 = arith.select %49, %38, %50 : vector<18x64xi1>, vector<18x64xf32>
    %c0_26 = arith.constant 0 : index
    %c0_27 = arith.constant 0 : index
    %52 = vector.load %arg15[%c0_26, %c0_27] : memref<24x64xf32, #tpu.memory_space<vmem>>, vector<18x64xf32>
    tpu.vector_store %arg15[%c0_26, %c0_27], %51 {strides = array<i32>} : memref<24x64xf32, #tpu.memory_space<vmem>>, vector<18x64xf32>,
    %cst_28 = arith.constant 0.000000e+00 : f32
    %53 = vector.broadcast %cst_28 : f32 to vector<16x64xf32>
    %c0_29 = arith.constant 0 : index
    %c0_30 = arith.constant 0 : index
    %54 = vector.load %arg15[%c0_29, %c0_30] : memref<24x64xf32, #tpu.memory_space<vmem>>, vector<16x64xf32>
    %c0_31 = arith.constant 0 : index
    %c0_32 = arith.constant 0 : index
    %c0_33 = arith.constant 0 : index
    %55 = vector.load %arg7[%c0_31, %c0_32, %c0_33] : memref<3x64x64xf32, #tpu.memory_space<vmem>>, vector<1x64x64xf32>
    %56 = vector.shape_cast %55 : vector<1x64x64xf32> to vector<64x64xf32>
    %cst_34 = arith.constant dense<0.000000e+00> : vector<16x64xf32>
    %57 = tpu.matmul %54, %56, %cst_34 {dimension_numbers = #tpu.dot_dimension_numbers<[1], [0], [0], [1], [0, 0, 1, 1], [], []>} : vector<16x64xf32>, vector<64x64xf32>, vector<16x64xf32> -> vector<16x64xf32>
    %58 = arith.addf %53, %57 : vector<16x64xf32>
    %c1_35 = arith.constant 1 : index
    %c0_36 = arith.constant 0 : index
    %59 = vector.load %arg15[%c1_35, %c0_36] : memref<24x64xf32, #tpu.memory_space<vmem>>, vector<16x64xf32>
    %c1_37 = arith.constant 1 : index
    %c0_38 = arith.constant 0 : index
    %c0_39 = arith.constant 0 : index
    %60 = vector.load %arg7[%c1_37, %c0_38, %c0_39] : memref<3x64x64xf32, #tpu.memory_space<vmem>>, vector<1x64x64xf32>
    %61 = vector.shape_cast %60 : vector<1x64x64xf32> to vector<64x64xf32>
    %cst_40 = arith.constant dense<0.000000e+00> : vector<16x64xf32>
    %62 = tpu.matmul %59, %61, %cst_40 {dimension_numbers = #tpu.dot_dimension_numbers<[1], [0], [0], [1], [0, 0, 1, 1], [], []>} : vector<16x64xf32>, vector<64x64xf32>, vector<16x64xf32> -> vector<16x64xf32>
    %63 = arith.addf %58, %62 : vector<16x64xf32>
    %c2_41 = arith.constant 2 : index
    %c0_42 = arith.constant 0 : index
    %64 = vector.load %arg15[%c2_41, %c0_42] : memref<24x64xf32, #tpu.memory_space<vmem>>, vector<16x64xf32>
    %c2_43 = arith.constant 2 : index
    %c0_44 = arith.constant 0 : index
    %c0_45 = arith.constant 0 : index
    %65 = vector.load %arg7[%c2_43, %c0_44, %c0_45] : memref<3x64x64xf32, #tpu.memory_space<vmem>>, vector<1x64x64xf32>
    %66 = vector.shape_cast %65 : vector<1x64x64xf32> to vector<64x64xf32>
    %cst_46 = arith.constant dense<0.000000e+00> : vector<16x64xf32>
    %67 = tpu.matmul %64, %66, %cst_46 {dimension_numbers = #tpu.dot_dimension_numbers<[1], [0], [0], [1], [0, 0, 1, 1], [], []>} : vector<16x64xf32>, vector<64x64xf32>, vector<16x64xf32> -> vector<16x64xf32>
    %68 = arith.addf %63, %67 : vector<16x64xf32>
    %c0_47 = arith.constant 0 : index
    %c0_48 = arith.constant 0 : index
    %69 = vector.load %arg8[%c0_47, %c0_48] : memref<1x64xf32, #tpu.memory_space<vmem>>, vector<1x64xf32>
    %70 = vector.broadcast %69 : vector<1x64xf32> to vector<16x64xf32>
    %71 = arith.addf %68, %70 : vector<16x64xf32>
    %cst_49 = arith.constant 0.000000e+00 : f32
    %72 = vector.broadcast %cst_49 : f32 to vector<16x64xf32>
    %73 = arith.maximumf %71, %72 : vector<16x64xf32>
    %c0_50 = arith.constant 0 : index
    %c0_51 = arith.constant 0 : index
    %74 = vector.load %arg9[%c0_50, %c0_51] : memref<1x64xf32, #tpu.memory_space<vmem>>, vector<1x64xf32>
    %75 = vector.broadcast %74 : vector<1x64xf32> to vector<16x64xf32>
    %76 = arith.mulf %73, %75 : vector<16x64xf32>
    %c0_52 = arith.constant 0 : index
    %c0_53 = arith.constant 0 : index
    %77 = vector.load %arg10[%c0_52, %c0_53] : memref<1x64xf32, #tpu.memory_space<vmem>>, vector<1x64xf32>
    %78 = vector.broadcast %77 : vector<1x64xf32> to vector<16x64xf32>
    %79 = arith.addf %76, %78 : vector<16x64xf32>
    %c0_54 = arith.constant 0 : index
    %c0_55 = arith.constant 0 : index
    %80 = vector.load %arg11[%c0_54, %c0_55] : memref<2x64xf32, #tpu.memory_space<vmem>>, vector<2x64xf32>
    %cst_56 = arith.constant dense<0.000000e+00> : vector<2x16xf32>
    %81 = tpu.matmul %80, %79, %cst_56 {dimension_numbers = #tpu.dot_dimension_numbers<[1], [1], [0], [0], [0, 0, 1, 0], [], []>} : vector<2x64xf32>, vector<16x64xf32>, vector<2x16xf32> -> vector<2x16xf32>
    %c0_57 = arith.constant 0 : index
    %c0_58 = arith.constant 0 : index
    %82 = vector.load %arg12[%c0_57, %c0_58] : memref<2x1xf32, #tpu.memory_space<vmem>>, vector<2x1xf32>
    %83 = vector.broadcast %82 : vector<2x1xf32> to vector<2x16xf32>
    %84 = arith.addf %81, %83 : vector<2x16xf32>
    %cst_59 = arith.constant 0.000000e+00 : f32
    %85 = vector.broadcast %cst_59 : f32 to vector<2x16xf32>
    %86 = arith.maximumf %84, %85 : vector<2x16xf32>
    %87 = math.absf %84 : vector<2x16xf32>
    %cst_60 = arith.constant 0.000000e+00 : f32
    %88 = vector.broadcast %cst_60 : f32 to vector<2x16xf32>
    %89 = arith.subf %88, %87 : vector<2x16xf32>
    %90 = math.exp %89 : vector<2x16xf32>
    %cst_61 = arith.constant 1.000000e+00 : f32
    %91 = vector.broadcast %cst_61 : f32 to vector<2x16xf32>
    %92 = arith.addf %91, %90 : vector<2x16xf32>
    %93 = math.log %92 : vector<2x16xf32>
    %94 = arith.addf %86, %93 : vector<2x16xf32>
    %c0_62 = arith.constant 0 : index
    %c0_63 = arith.constant 0 : index
    %c0_64 = arith.constant 0 : index
    %95 = vector.load %arg13[%c0_62, %c0_63, %c0_64] : memref<1x2x16xf32, #tpu.memory_space<vmem>>, vector<1x2x16xf32>
    %96 = vector.shape_cast %95 : vector<1x2x16xf32> to vector<2x16xf32>
    %97 = vector.shape_cast %94 : vector<2x16xf32> to vector<1x2x16xf32>
    tpu.vector_store %arg13[%c0_62, %c0_63, %c0_64], %97 {strides = array<i32>} : memref<1x2x16xf32, #tpu.memory_space<vmem>>, vector<1x2x16xf32>,
    return
  }
  func.func @transform_0(%arg0: i32, %arg1: i32) -> (i32, i32, i32) {
    %c0_i32 = arith.constant 0 : i32
    %c0_i32_0 = arith.constant 0 : i32
    %c0_i32_1 = arith.constant 0 : i32
    return %arg0, %c0_i32, %c0_i32_0 : i32, i32, i32
  }
  func.func @transform_1(%arg0: i32, %arg1: i32) -> (i32, i32, i32) {
    %c0_i32 = arith.constant 0 : i32
    %c0_i32_0 = arith.constant 0 : i32
    %c0_i32_1 = arith.constant 0 : i32
    %c0_i32_2 = arith.constant 0 : i32
    return %c0_i32, %c0_i32_0, %c0_i32_1 : i32, i32, i32
  }
  func.func @transform_2(%arg0: i32, %arg1: i32) -> (i32, i32) {
    %c0_i32 = arith.constant 0 : i32
    %c0_i32_0 = arith.constant 0 : i32
    %c0_i32_1 = arith.constant 0 : i32
    return %c0_i32, %c0_i32_0 : i32, i32
  }
  func.func @transform_3(%arg0: i32, %arg1: i32) -> (i32, i32) {
    %c0_i32 = arith.constant 0 : i32
    %c0_i32_0 = arith.constant 0 : i32
    %c0_i32_1 = arith.constant 0 : i32
    return %c0_i32, %c0_i32_0 : i32, i32
  }
  func.func @transform_4(%arg0: i32, %arg1: i32) -> (i32, i32) {
    %c0_i32 = arith.constant 0 : i32
    %c0_i32_0 = arith.constant 0 : i32
    %c0_i32_1 = arith.constant 0 : i32
    return %c0_i32, %c0_i32_0 : i32, i32
  }
  func.func @transform_5(%arg0: i32, %arg1: i32) -> (i32, i32, i32) {
    %c0_i32 = arith.constant 0 : i32
    %c0_i32_0 = arith.constant 0 : i32
    %c0_i32_1 = arith.constant 0 : i32
    %c0_i32_2 = arith.constant 0 : i32
    return %c0_i32, %c0_i32_0, %c0_i32_1 : i32, i32, i32
  }
  func.func @transform_6(%arg0: i32, %arg1: i32) -> (i32, i32) {
    %c0_i32 = arith.constant 0 : i32
    %c0_i32_0 = arith.constant 0 : i32
    %c0_i32_1 = arith.constant 0 : i32
    return %c0_i32, %c0_i32_0 : i32, i32
  }
  func.func @transform_7(%arg0: i32, %arg1: i32) -> (i32, i32) {
    %c0_i32 = arith.constant 0 : i32
    %c0_i32_0 = arith.constant 0 : i32
    %c0_i32_1 = arith.constant 0 : i32
    return %c0_i32, %c0_i32_0 : i32, i32
  }
  func.func @transform_8(%arg0: i32, %arg1: i32) -> (i32, i32) {
    %c0_i32 = arith.constant 0 : i32
    %c0_i32_0 = arith.constant 0 : i32
    %c0_i32_1 = arith.constant 0 : i32
    return %c0_i32, %c0_i32_0 : i32, i32
  }
  func.func @transform_9(%arg0: i32, %arg1: i32) -> (i32, i32) {
    %c0_i32 = arith.constant 0 : i32
    %c0_i32_0 = arith.constant 0 : i32
    %c0_i32_1 = arith.constant 0 : i32
    return %c0_i32, %c0_i32_0 : i32, i32
  }
  func.func @transform_10(%arg0: i32, %arg1: i32) -> (i32, i32) {
    %c0_i32 = arith.constant 0 : i32
    %c0_i32_0 = arith.constant 0 : i32
    %c0_i32_1 = arith.constant 0 : i32
    return %c0_i32, %c0_i32_0 : i32, i32
  }
  func.func @transform_11(%arg0: i32, %arg1: i32) -> (i32, i32, i32) {
    %c0_i32 = arith.constant 0 : i32
    %c0_i32_0 = arith.constant 0 : i32
    return %arg0, %c0_i32, %arg1 : i32, i32, i32
  }
}

</mosaic_0001>

<bundles_post_ra>
// kernel: tpu_custom_call.1
= control target key start
LH: loop header
LB: loop body
LE: loop exit
PB: predicated region body
PF: predicated region fallthrough
CT: control target
= control target key end

     0   :  { %16 = vsyncpa [#allocation5], 0  ;;  %s2030_s0 = inlined_call_operand.vmem [shape: f32[2,16,8], index: 0, kind: input, shape index: {}]   ;;  %s2031_s1 = inlined_call_operand.vmem [shape: f32[3,8,64], index: 1, kind: input, shape index: {}]   ;;  %s2032_s2 = inlined_call_operand.vmem [shape: f32[1,64], index: 2, kind: input, shape index: {}]   ;;  %s2033_s3 = inlined_call_operand.vmem [shape: f32[1,64], index: 3, kind: input, shape index: {}]   ;;  %s2034_s4 = inlined_call_operand.vmem [shape: f32[1,64], index: 4, kind: input, shape index: {}]   ;;  %s2035_s5 = inlined_call_operand.hbm [shape: f32[3,64,64], index: 5, kind: input, shape index: {}]   ;;  %s2036_s6 = inlined_call_operand.vmem [shape: f32[1,64], index: 6, kind: input, shape index: {}]   ;;  %s2037_s7 = inlined_call_operand.vmem [shape: f32[1,64], index: 7, kind: input, shape index: {}]   ;;  %s2038_s8 = inlined_call_operand.vmem [shape: f32[1,64], index: 8, kind: input, shape index: {}]   ;;  %s2039_s9 = inlined_call_operand.vmem [shape: f32[2,64], index: 9, kind: input, shape index: {}]   ;;  %s2040_s10 = inlined_call_operand.vmem [shape: f32[2,1], index: 10, kind: input, shape index: {}]   ;;  %s2041_s11 = inlined_call_operand.hbm [shape: f32[2,2,16], index: 11, kind: output, shape index: {}]  }
   0x1   :  { %17 = vsyncpa [#allocation6], 0 }
   0x2   :  { %19 = vsyncpa [#allocation6 + $0x1], 0  ;;  %s1794_s17 = smov 0   ;;  %s1796_s18 = smov 0  }
   0x3   :  { %s1798_s19 = smov 0   ;;  %s1800_s20 = smov 0  }
   0x4   :  { %s1802_s21 = smov 0   ;;  %s1804_s22 = smov 0  }
   0x5 LB: > { %2048 = sst [smem:[#allocation10_spill]] %s1720_s21  ;;  %s1289_s23 = sadd.s32 4294967295, %s1724_s22   ;;  %s1724_s22 = sphi %s1804_s22, %s25_s22   ;;  %s1720_s21 = sphi %s1802_s21, %s2062_s21   ;;  %s1716_s20 = sphi %s1800_s20, %s2061_s20   ;;  %s1712_s19 = sphi %s1798_s19, %s2065_s19   ;;  %s1708_s18 = sphi %s1796_s18, %s2064_s18   ;;  %s1704_s17 = sphi %s1794_s17, %s2063_s17  }
   0x6   : > { %s1290_s24 = sadd.s32 4294967294, %s1724_s22   ;;  %s37_s25 = sadd.s32 1, %s1720_s21 }
   0x7   : > { %s282_s26 = sadd.s32 1, %s1712_s19  ;;  %p39_p0 = scmp.ge.s32.totalorder %s37_s25, 2 }
   0x8   : > { %p292_p1 = scmp.ne.s32.totalorder %s1712_s19, %s1708_s18  ;;  %p293_p2 = scmp.eq.s32.totalorder %s1289_s23, 1 }
   0x9   : > { %p298_p3 = scmp.ne.s32.totalorder %s1708_s18, %s1704_s17  ;;  %s2067_s25 = smov (%p39_p0, %s37_s25), 0 }
   0xa   : > { %2049 = sst [smem:[#allocation11_spill]] %s2067_s25  ;;  %p1834_p4 = por %p293_p2, %p292_p1 }
   0xb   : > { %p299_p5 = scmp.eq.s32.totalorder %s1290_s24, 1  ;;  %s277_s28 = ssub.s32 %s1720_s21, %s2067_s25 }
   0xc   : > { %s2050_s27 = scalar_select %p1834_p4, 1, 0 }
   0xd   : > { %p1291_p6 = scmp.ge.s32.totalorder %s1724_s22, 1  ;;  %p280_p7 = scmp.eq.s32.totalorder %s277_s28, 0 }
   0xe   : > { %p1841_p8 = por %p299_p5, %p298_p3  ;;  %p306_p9 = scmp.lt.s32.totalorder %s1724_s22, 3 }
   0xf   : > { %s1847_s30 = scalar_select %p280_p7, %s1712_s19, %s282_s26  }
  0x10   : > { %s2051_s29 = scalar_select %p1841_p8, 1, 0 }
  0x11   : > { %2052 = sst [smem:[#allocation12_spill]] %s1847_s30  ;;  %p1849_p10 = pnand %p1291_p6, %p306_p9 }
  0x12   : > { %p1853_p11 = scmp.eq.s32.totalorder %s1289_s23, 0  ;;  %s1726_s14 = smov [#allocation4]  }
  0x13   : > { %s2053_s12 = scalar_select %p1849_p10, 1, 0 }
  0x14   : > { %s2054_s13 = scalar_select %p1853_p11, 1, 0 }
  0x15   : > { %p1543_p12 = pneg %p1849_p10  ;;  %s330_s15 = sshll.u32 %s1726_s14, 4  ;;  %s331_s15 = int_to_ptr.vmem [resolvable:$true] %s330_s15 }
  0x16   : > { %s1614_s28 = scalar_lea.hbm %s2035_s5, 3072 }
  0x17   : > { %p1861_p13 = pnand %p1853_p11, %p1543_p12  ;;  %p1615_p0 = scmp.ne.s32.totalorder %s2035_s5, %s1614_s28 }
  0x18   : > { %p1621_p5 = scmp.lt.u32.totalorder %s1614_s28, %s2035_s5 }
  0x19   : > { %p1616_p1 = pneg %p1861_p13 }
  0x1b   : > { %p1617_p2 = pnand %p1616_p1, %p1615_p0 }
  0x1d   : > { %p1618_p3 = pneg %p1617_p2 }
  0x1f   : > { %p1623_p6 = pnand %p1621_p5, %p1618_p3 }
  0x21   : > { %1626 = shalt.err (!%p1623_p6)
}
  0x22   : > { %s1627_s30 = scalar_lea.vmem %s331_s15, 3072  ;;  %p1635_p8 = scmp.lt.s32.totalorder %s331_s15, %s331_s15 }
  0x23   : > { %p1628_p7 = scmp.ne.s32.totalorder %s331_s15, %s1627_s30  ;;  %p1636_p4 = scmp.lt.s32.totalorder %s1627_s30, %s1627_s30 }
  0x25   : > { %p1630_p9 = pnand %p1628_p7, %p1616_p1  ;;  %p1637_p11 = por %p1636_p4, %p1635_p8 }
  0x27   : > { %p1631_p12 = pneg %p1630_p9 }
  0x29   : > { %p1638_p10 = pnand %p1637_p11, %p1631_p12 }
  0x2b   : > { %1641 = shalt.err (!%p1638_p10)
}
  0x2c   : > { %s1727_s25 = smov 128   ;;  %s1728_s24 = smov 8  }
  0x2d   : > { %1546 = dma.hbm_to_vmem [thread:$0]  (!%p1861_p13), %s2035_s5, 3072, %s331_s15, [#allocation5], %s1727_s25, %s1727_s25, %s1728_s24  }
  0x2e   : > { %p2056_p0 = scmp.ne.s32.totalorder %s2053_s12, 0 }
  0x2f   : > { %p2057_p2 = scmp.ne.s32.totalorder (!%p2056_p0), %s2054_s13, 0 }
  0x30   : > { %369 = sbr.rel (%p2056_p0) target bundleno = 828 (0x33c), region = 64 }
  0x37   : > { %1695 = dma.done.wait (%p2057_p2), [#allocation5], 3072  }
  0x38   : > { %1697 = vsyncadd (%p2057_p2), [#allocation5], 4294964224  ;;  %p409_p4 = scmp.lt.s32.totalorder %s1716_s20, 1  ;;  %vm419_vm0 = vcmask 64512   ;;  %v1729_v0 = vmov 0.0   ;;  %vm1730_vm1 = vmmov 0   ;;  %v750_v54 = vlaneseq }
  0x39   : > { %1384 = vmatprep.subr.mxu0 %v1729_v0  ;;  %1395 = vmatprep.subr.mxu1 %v1729_v0  ;;  %420 = vst.msk [vmem:[#allocation2] sm:$0xff] %vm419_vm0, %v1729_v0  ;;  %421 = vst.msk [vmem:[#allocation2 + $0x18] sm:$0xff] %vm419_vm0, %v1729_v0  ;;  %v1305_v1 = vld [vmem:[%s2031_s1 + $0x8] sm:$0xff]  ;;  %v432_v2 = vld [vmem:[%s2031_s1] sm:$0xff]  ;;  %vm777_vm3 = vcmask 523264   ;;  %vm780_vm5 = vcmask 517120  }
  0x3a   : > { %1386 = vmatprep.mubr.msk.f32.mxu0 %vm1730_vm1, %v1729_v0  ;;  %1397 = vmatprep.mubr.msk.f32.mxu1 %vm1730_vm1, %v1729_v0  ;;  %s410_s21 = scalar_select %p409_p4, %s1716_s20, 1  ;;  %v1315_v5 = vld [vmem:[%s2031_s1 + $0x10] sm:$0xff]  ;;  %v784_v15 = vld [vmem:[#allocation4] sm:$0xff]  ;;  %v785_v16 = vld [vmem:[#allocation4 + $0x8] sm:$0xff]  ;;  %v751_v60 = vshrl.u32 %v750_v54, 7  ;;  %vm1183_vm7 = vcmask 123904  }
  0x3b   : > { %1385 = vmatpush3.msra.mxu0 %v1305_v1  ;;  %1396 = vmatpush3.msra.mxu1 %v432_v2  ;;  %v1497_v17 = vpack.c.bf16 %v785_v16, %v784_v15  ;;  %v786_v18 = vld [vmem:[#allocation4 + $0x10] sm:$0xff]  ;;  %v787_v19 = vld [vmem:[#allocation4 + $0x18] sm:$0xff]  ;;  %v795_v21 = vld [vmem:[#allocation4 + $0x40] sm:$0xff]  ;;  %s406_s13 = sand.u32 1, %s1708_s18   ;;  %s1335_s16 = sshll.u32 %s1716_s20, 5 }
  0x3c   : > { %s1338_s30 = sshll.u32 %s410_s21, 4  ;;  %1406 = vmatprep.subr.mxu0 %v1729_v0  ;;  %v1501_v20 = vpack.c.bf16 %v787_v19, %v786_v18  ;;  %v796_v22 = vld [vmem:[#allocation4 + $0x48] sm:$0xff]  ;;  %v788_v24 = vld [vmem:[#allocation4 + $0x20] sm:$0xff]  ;;  %v797_v27 = vld [vmem:[#allocation4 + $0x50] sm:$0xff]  ;;  %v756_v2 = vadd.s32 4294967295, %v751_v60  ;;  %s1983_s26 = scalar_lea.hbm %s2041_s11, %s1335_s16 }
  0x3d   : > { %s413_s15 = scalar_lea.vmem %s2030_s0, %s1338_s30  ;;  %1498 = vmatprep.subr.bf16.mxu1 %v1497_v17  ;;  %v1481_v23 = vpack.c.bf16 %v796_v22, %v795_v21  ;;  %v789_v25 = vld [vmem:[#allocation4 + $0x28] sm:$0xff]  ;;  %v798_v28 = vld [vmem:[#allocation4 + $0x58] sm:$0xff]  ;;  %v790_v30 = vld [vmem:[#allocation4 + $0x30] sm:$0xff]  ;;  %s1186_s23 = scalar_lea.sflag [#allocation6], %s406_s13 }
  0x3e   : > { %v422_v3 = vld [vmem:[%s413_s15] sm:$0xff]  ;;  %v423_v4 = vld [vmem:[%s413_s15 + $0x8] sm:$0xff]  ;;  %v1505_v26 = vpack.c.bf16 %v789_v25, %v788_v24  ;;  %v1485_v29 = vpack.c.bf16 %v798_v28, %v797_v27  ;;  %v791_v31 = vld [vmem:[#allocation4 + $0x38] sm:$0xff]  ;;  %vm759_vm2 = vcmp.ge.s32.totalorder %v756_v2, 0  ;;  %s1296_s15 = sshll.u32 %s406_s13, 1  ;;  %p2058_p10 = scmp.ne.s32.totalorder %s2050_s27, 0 }
  0x3f   : > { %424 = vst.msk [vmem:[#allocation2 + $0x8] sm:$0xff] %vm419_vm0, %v422_v3  ;;  %425 = vst.msk [vmem:[#allocation2 + $0x10] sm:$0xff] %vm419_vm0, %v423_v4  ;;  %v1509_v32 = vpack.c.bf16 %v791_v31, %v790_v30  ;;  %v799_v33 = vld [vmem:[#allocation4 + $0x60] sm:$0xff]  ;;  %v800_v34 = vld [vmem:[#allocation4 + $0x68] sm:$0xff]  ;;  %s408_s28 = scalar_lea.vmem [#allocation7], %s1296_s15  ;;  %s1733_s20 = smov [#allocation7]  }
  0x40   : > { %v1314_v14 = vld [vmem:[#allocation2 + $0x18] sm:$0x3]  ;;  %v1489_v35 = vpack.c.bf16 %v800_v34, %v799_v33  ;;  %v969_v37 = vld [vmem:[#allocation4 + $0x88] sm:$0xff]  ;;  %v801_v39 = vld [vmem:[#allocation4 + $0x70] sm:$0xff]  ;;  %s1200_s14 = sshll.u32 %s408_s28, 4  ;;  %s1646_s30 = sshll.u32 %s1733_s20, 4  ;;  %s1985_s14 = int_to_ptr.vmem [resolvable:$true] %s1200_s14  ;;  %s1647_s30 = int_to_ptr.vmem [resolvable:$false] %s1646_s30 }
  0x41   : > { %v968_v36 = vld [vmem:[#allocation4 + $0x80] sm:$0xff]  ;;  %v802_v40 = vld [vmem:[#allocation4 + $0x78] sm:$0xff]  ;;  %v1319_v59 = vld [vmem:[%s2032_s2] ss:$0 sm:$0xff]  ;;  %s1642_s21 = scalar_lea.vmem %s1985_s14, 32  ;;  %s1648_s12 = scalar_lea.vmem %s1647_s30, 64 }
  0x42   : > { %v1937_v38 = vpack.c.bf16 %v969_v37, %v968_v36  ;;  %v1493_v41 = vpack.c.bf16 %v802_v40, %v801_v39  ;;  %v1320_v1 = vld [vmem:[%s2033_s3] ss:$0 sm:$0xff]  ;;  %v970_v24 = vld [vmem:[#allocation4 + $0x90] sm:$0xff]  ;;  %v971_v25 = vld [vmem:[#allocation4 + $0x98] sm:$0xff]  ;;  %p1643_p8 = scmp.ne.s32.totalorder %s1985_s14, %s1642_s21  ;;  %p1649_p1 = scmp.lt.s32.totalorder %s1985_s14, %s1647_s30 }
  0x43   : > { %v1517_v28 = vpack.c.bf16 %v971_v25, %v970_v24  ;;  %v973_v30 = vld [vmem:[#allocation4 + $0xa8] sm:$0xff]  ;;  %v975_v36 = vld [vmem:[#allocation4 + $0xb8] sm:$0xff]  ;;  %vm1531_vm6 = vmpackc.low %vm777_vm3, %vm777_vm3  ;;  %p1650_p3 = scmp.lt.s32.totalorder %s1648_s12, %s1642_s21 }
  0x44   : > { %p1644_p11 = pnand %p1643_p8, %p2058_p10 }
  0x45   : > { %p1651_p5 = por %p1650_p3, %p1649_p1 }
  0x46   : > { %v1302_v6 = vld [vmem:[#allocation2 + $0x7] sm:$0xff]  ;;  %v1303_v8 = vld [vmem:[#allocation2 + $0xf] sm:$0xff]  ;;  %v1304_v10 = vld [vmem:[#allocation2 + $0x17] sm:$0x3]  ;;  %p1645_p13 = pneg %p1644_p11 }
  0x47   : > { %v1299_v7 = vld [vmem:[#allocation2 + $0x6] sm:$0xff]  ;;  %1387 = vmatmul.mubr.msk.f32.vlgmr.msra.gmra.mrb[0].mxu0 %vm419_vm0, %v1302_v6  ;;  %v1300_v9 = vld [vmem:[#allocation2 + $0xe] sm:$0xff]  ;;  %v1301_v11 = vld [vmem:[#allocation2 + $0x16] sm:$0x3] }
  0x48   : > { %1398 = vmatmul.mubr.msk.f32.vlgmr.msra.gmra.mrb[0].mxu1 %vm419_vm0, %v1299_v7  ;;  %1407 = vmatpush3.msra.mxu0 %v1315_v5  ;;  %v1312_v12 = vld [vmem:[#allocation2 + $0x8] sm:$0xff]  ;;  %v1313_v13 = vld [vmem:[#allocation2 + $0x10] sm:$0xff]  ;;  %v1321_v7 = vld [vmem:[%s2034_s4] ss:$0 sm:$0xff]  ;;  %p1652_p6 = pnand %p1651_p5, %p1645_p13 }
  0x49   : > { %1389 = vmatprep.mubr.msk.f32.mxu0 %vm1730_vm1, %v1729_v0  ;;  %1400 = vmatprep.mubr.msk.f32.mxu1 %vm1730_vm1, %v1729_v0 }
  0x4a   : > { %1500 = vmatpush3.bf16.msra.mxu1 %v1497_v17  ;;  %1482 = vmatprep.subr.bf16.mxu0 %v1481_v23 }
  0x4b   : > { %1390 = vmatmul.mubr.msk.f32.gmra.mrb[2].mxu0 %vm419_vm0, %v1303_v8  ;;  %1502 = vmatprep.subr.bf16.mxu1 %v1501_v20 }
  0x4c   : > { %1401 = vmatmul.mubr.msk.f32.gmra.mrb[2].mxu1 %vm419_vm0, %v1300_v9  ;;  %1392 = vmatprep.mubr.msk.f32.mxu0 %vm1730_vm1, %v1729_v0 }
  0x4d   : > { %1403 = vmatprep.mubr.msk.f32.mxu1 %vm1730_vm1, %v1729_v0 }
  0x4e   : > { %1504 = vmatpush3.bf16.msra.mxu1 %v1501_v20 }
  0x4f   : > { %1393 = vmatmul.mubr.msk.f32.gmra.mrb[4].mxu0 %vm419_vm0, %v1304_v10  ;;  %1506 = vmatprep.subr.bf16.mxu1 %v1505_v26 }
  0x50   : > { %1404 = vmatmul.mubr.msk.f32.gmra.mrb[4].mxu1 %vm419_vm0, %v1301_v11  ;;  %1408 = vmatprep.mubr.msk.f32.mxu0 %vm1730_vm1, %v1729_v0  ;;  %v753_v11 = vadd.s32 16, %v751_v60  ;;  %v1088_v60 = vld [vmem:[%s2039_s9] sm:$0x3] }
  0x52   : > { %1508 = vmatpush3.bf16.msra.mxu1 %v1505_v26  ;;  %v758_v19 = vadd.s32 4294967295, %v753_v11 }
  0x53   : > { %1409 = vmatmul.mubr.msk.f32.vlgmr.msra.gmra.mrb[6].mxu0 %vm419_vm0, %v1312_v12  ;;  %1510 = vmatprep.subr.bf16.mxu1 %v1509_v32 }
  0x54   : > { %1411 = vmatprep.mubr.msk.f32.mxu0 %vm1730_vm1, %v1729_v0  ;;  %1484 = vmatpush3.bf16.msra.mxu0 %v1481_v23  ;;  %vm764_vm4 = vcmp.lt.s32.totalorder %v758_v19, 16 }
  0x55   : > { %1486 = vmatprep.subr.bf16.mxu0 %v1485_v29 }
  0x56   : > { %1512 = vmatpush3.bf16.msra.mxu1 %v1509_v32 }
  0x57   : > { %1412 = vmatmul.mubr.msk.f32.gmra.mrb[8].mxu0 %vm419_vm0, %v1313_v13  ;;  %1514 = vmatprep.subr.bf16.mxu1 %v1937_v38 }
  0x58   : > { %1414 = vmatprep.mubr.msk.f32.mxu0 %vm1730_vm1, %v1729_v0  ;;  %1488 = vmatpush3.bf16.msra.mxu0 %v1485_v29  ;;  %v972_v29 = vld [vmem:[#allocation4 + $0xa0] sm:$0xff] }
  0x59   : > { %1490 = vmatprep.subr.bf16.mxu0 %v1489_v35  ;;  %v1521_v34 = vpack.c.bf16 %v973_v30, %v972_v29 }
  0x5b   : > { %1415 = vmatmul.mubr.msk.f32.gmra.mrb[10].mxu0 %vm419_vm0, %v1314_v14 }
  0x5c   : > { %1492 = vmatpush3.bf16.msra.mxu0 %v1489_v35  ;;  %v974_v35 = vld [vmem:[#allocation4 + $0xb0] sm:$0xff] }
  0x5d   : > { %1494 = vmatprep.subr.bf16.mxu0 %v1493_v41  ;;  %v1525_v39 = vpack.c.bf16 %v975_v36, %v974_v35 }
  0x60   : > { %1496 = vmatpush3.bf16.msra.mxu0 %v1493_v41  ;;  %v1089_v41 = vld [vmem:[%s2040_s10] sm:$0x3] }
 0x11a   : > { %v516_v42 = vpop.f32.mrb[0].mxu0 }
 0x11b   : > { %v605_v43 = vpop.f32.mrb[0].mxu1  ;;  %v1388_v45 = vpop.f32.mrb[1].mxu0 }
 0x11c   : > { %v606_v44 = vadd.f32 %v605_v43, %v516_v42  ;;  %v1399_v46 = vpop.f32.mrb[1].mxu1  ;;  %v1732_v42 = vmov 0  }
 0x11d   : > { %1609 = vset.pattern.permute.xlu0 %v1732_v42 }
 0x11e   : > { %v521_v47 = vpop.f32.mrb[2].mxu0  ;;  %1092 = vperm.xlu0 %1609, %v1089_v41  }
 0x11f   : > { %v610_v48 = vpop.f32.mrb[2].mxu1  ;;  %v1391_v50 = vpop.f32.mrb[3].mxu0 }
 0x120   : > { %v611_v49 = vadd.f32 %v610_v48, %v521_v47  ;;  %v1402_v51 = vpop.f32.mrb[3].mxu1  ;;  %v1329_v50 = vld [vmem:[%s2037_s7] ss:$0 sm:$0xff] }
 0x122   : > { %v526_v52 = vpop.f32.mrb[4].mxu0 }
 0x123   : > { %v615_v53 = vpop.f32.mrb[4].mxu1  ;;  %v1394_v56 = vpop.f32.mrb[5].mxu0 }
 0x124   : > { %v616_v55 = vadd.f32 %v615_v53, %v526_v52  ;;  %v1405_v57 = vpop.f32.mrb[5].mxu1  ;;  %v1330_v53 = vld [vmem:[%s2038_s8] ss:$0 sm:$0xff] }
 0x126   : > { %v700_v58 = vpop.f32.mrb[6].mxu0 }
 0x127   : > { %v714_v61 = vadd.f32 %v700_v58, %v606_v44  ;;  %v1410_v62 = vpop.f32.mrb[7].mxu0 }
 0x129   : > { %v724_v63 = vadd.f32 %v1319_v59, %v714_v61 }
 0x12a   : > { %v705_v3 = vpop.f32.mrb[8].mxu0 }
 0x12b   : > { %v727_v4 = vmax.f32 %v724_v63, 0.0  ;;  %v715_v5 = vadd.f32 %v705_v3, %v611_v49  ;;  %v1413_v6 = vpop.f32.mrb[9].mxu0 }
 0x12d   : > { %v737_v8 = vmul.f32 %v1320_v1, %v727_v4  ;;  %v725_v9 = vadd.f32 %v1319_v59, %v715_v5 }
 0x12e   : > { %v710_v10 = vpop.f32.mrb[10].mxu0 }
 0x12f   : > { %v747_v12 = vadd.f32 %v1321_v7, %v737_v8  ;;  %v728_v13 = vmax.f32 %v725_v9, 0.0  ;;  %v716_v14 = vadd.f32 %v710_v10, %v616_v55  ;;  %v1416_v15 = vpop.f32.mrb[11].mxu0 }
 0x131   : > { %v774_v16 = vsel %vm759_vm2, %v747_v12, 0.0  ;;  %v738_v17 = vmul.f32 %v1320_v1, %v728_v13  ;;  %v726_v18 = vadd.f32 %v1319_v59, %v716_v14 }
 0x132   : > { %778 = vst.msk [vmem:[#allocation3] sm:$0xff] %vm777_vm3, %v774_v16 }
 0x133   : > { %v748_v20 = vadd.f32 %v1321_v7, %v738_v17  ;;  %v729_v21 = vmax.f32 %v726_v18, 0.0 }
 0x135   : > { %779 = vst.msk [vmem:[#allocation3 + $0x8] sm:$0xff] %vm777_vm3, %v748_v20  ;;  %v739_v22 = vmul.f32 %v1320_v1, %v729_v21 }
 0x137   : > { %v749_v23 = vadd.f32 %v1321_v7, %v739_v22 }
 0x139   : > { %v776_v26 = vsel %vm764_vm4, %v749_v23, 0.0  ;;  %v782_v27 = vld [vmem:[#allocation3] sm:$0xff] }
 0x13a   : > { %781 = vst.msk [vmem:[#allocation3 + $0x10] sm:$0x3] %vm780_vm5, %v776_v26  ;;  %1452 = vmatprep.mubr.msk.f32.mxu1 %vm777_vm3, %v782_v27 }
 0x13c   : > { %v792_v31 = vld [vmem:[#allocation3 + $0x1] sm:$0xff] }
 0x13d   : > { %v783_v32 = vld [vmem:[#allocation3 + $0x8] sm:$0xff]  ;;  %1433 = vmatprep.mubr.msk.f32.mxu0 %vm777_vm3, %v792_v31 }
 0x13e   : > { %v965_v33 = vld [vmem:[#allocation3 + $0x2] sm:$0xff]  ;;  %1453 = vmatmul.mubr.msk.f32.vlgmr.msra.gmra.mrb[6].mxu1 %vm777_vm3, %v783_v32 }
 0x13f   : > { %1516 = vmatpush3.bf16.msra.mxu1 %v1937_v38  ;;  %1471 = vmatprep.mubr.msk.f32.mxu1 %vm777_vm3, %v965_v33  ;;  %v1731_v38 = vmov 0.0|0.0  }
 0x140   : > { %1518 = vmatprep.subr.bf16.mxu1 %v1517_v28  ;;  %1529 = vmatprep.subr.bf16.mxu0 %v1731_v38 }
 0x141   : > { %v793_v37 = vld [vmem:[#allocation3 + $0x9] sm:$0xff] }
 0x142   : > { %1434 = vmatmul.mubr.msk.f32.vlgmr.msra.gmra.mrb[12].mxu0 %vm777_vm3, %v793_v37  ;;  %v966_v40 = vld [vmem:[#allocation3 + $0xa] sm:$0xff] }
 0x143   : > { %1520 = vmatpush3.bf16.msra.mxu1 %v1517_v28  ;;  %1478 = vmatprep.mubr.msk.f32.mxu0 %vm1730_vm1, %v1729_v0  ;;  %v1328_v0 = vld [vmem:[%s2036_s6] ss:$0 sm:$0xff] }
 0x144   : > { %1522 = vmatprep.subr.bf16.mxu1 %v1521_v34 }
 0x147   : > { %1524 = vmatpush3.bf16.msra.mxu1 %v1521_v34 }
 0x148   : > { %1526 = vmatprep.subr.bf16.mxu1 %v1525_v39 }
 0x14b   : > { %1528 = vmatpush3.bf16.msra.mxu1 %v1525_v39 }
 0x14e   : > { %1472 = vmatmul.mubr.msk.f32.vlgmr.msra.gmra.mrb[6].mxu1 %vm777_vm3, %v966_v40 }
 0x19d   : > { %v1093_v61 = vpop.permute.xlu0 %1092 }
 0x215   : > { %v1435_v43 = vpop.f32.mrb[12].mxu0 }
 0x216   : > { %v875_v44 = vpop.f32.mrb[13].mxu0 }
 0x221   : > { %v1473_v45 = vpop.f32.mrb[6].mxu1 }
 0x222   : > { %v1533_v46 = vadd.f32 %v1473_v45, %v1435_v43  ;;  %v1048_v47 = vpop.f32.mrb[7].mxu1 }
 0x223   : > { %v1534_v48 = vadd.f32 %v1048_v47, %v875_v44 }
 0x224   : > { %v1067_v49 = vadd.f32 %v1533_v46, %v1328_v0 }
 0x225   : > { %v1066_v51 = vadd.f32 %v1534_v48, %v1328_v0 }
 0x226   : > { %v1069_v52 = vmax.f32 %v1067_v49, 0.0 }
 0x227   : > { %v1068_v54 = vmax.f32 %v1066_v51, 0.0 }
 0x228   : > { %v1078_v55 = vmul.f32 %v1329_v50, %v1069_v52 }
 0x229   : > { %v1077_v56 = vmul.f32 %v1329_v50, %v1068_v54 }
 0x22a   : > { %v1087_v57 = vadd.f32 %v1330_v53, %v1078_v55 }
 0x22b   : > { %v1086_v58 = vadd.f32 %v1330_v53, %v1077_v56 }
 0x22d   : > { %v1530_v59 = vpack.c.bf16 %v1087_v57, %v1086_v58 }
 0x22f   : > { %1532 = vmatpush3.bf16.xpose.msk.msra.mxu0 %vm1531_vm6, %v1530_v59 }
 0x236   : > { %1479 = vmatmul.mubr.msk.f32.vlgmr.msra.gmra.mrb[14].mxu0 %vm777_vm3, %v1088_v60 }
 0x309   : > { %v1170_v62 = vpop.f32.mrb[14].mxu0 }
 0x30a   : > { %v1171_v63 = vadd.f32 %v1170_v62, %v1093_v61  ;;  %v1480_v1 = vpop.f32.mrb[15].mxu0 }
 0x30c   : > { %v1175_v2 = vand.u32 2147483647, %v1171_v63  ;;  %v1174_v8 = vmax.f32 %v1171_v63, 0.0 }
 0x30e   : > { %v1176_v3 = vsub.f32 0.0, %v1175_v2 }
 0x310   : > { %v1177_v4 = vmul.f32 1.442695, %v1176_v3 }
 0x312   : > { %1610 = vpow2.f32 %v1177_v4 }
 0x31c   : > { %v1611_v5 = vpop.eup %1610 }
 0x31d   : > { %v1179_v6 = vadd.f32 1.0, %v1611_v5 }
 0x31f   : > { %1612 = vlog2.f32 %v1179_v6 }
 0x329   : > { %v1613_v7 = vpop.eup %1612 }
 0x32a   : > { %v1181_v9 = vmul.f32 0.6931472, %v1613_v7 }
 0x32c   : > { %v1182_v10 = vadd.f32 %v1181_v9, %v1174_v8 }
 0x32e   : > { %1184 = vst.msk [vmem:[%s408_s28] sm:$0x3] %vm1183_vm7, %v1182_v10 }
 0x32f   : > { %1655 = shalt.err (!%p1652_p6)
}
 0x330   : > { %s1656_s13 = scalar_lea.hbm %s1983_s26, 32  ;;  %s1660_s28 = scalar_lea.hbm %s2041_s11, 64 }
 0x331   : > { %p1657_p7 = scmp.ne.s32.totalorder %s1983_s26, %s1656_s13  ;;  %p1661_p0 = scmp.lt.u32.totalorder %s1983_s26, %s2041_s11 }
 0x332   : > { %p1662_p2 = scmp.lt.u32.totalorder %s1660_s28, %s1656_s13  ;;  %p1664_p8 = scmp.lt.u32.totalorder %s1656_s13, %s1983_s26 }
 0x333   : > { %p1658_p9 = pnand %p1657_p7, %p2058_p10 }
 0x334   : > { %p1663_p4 = por %p1662_p2, %p1661_p0 }
 0x335   : > { %p1659_p12 = pneg %p1658_p9 }
 0x336   : > { %p1665_p11 = por %p1664_p8, %p1663_p4 }
 0x338   : > { %p1666_p13 = pnand %p1665_p11, %p1659_p12 }
 0x33a   : > { %1669 = shalt.err (!%p1666_p13)
}
 0x33b   : > { %1541 = dma.vmem_to_hbm [thread:$0]  (%p2058_p10), %s1985_s14, 32, %s1983_s26, %s1186_s23  }
 0x33c PF: > { %p1553_p1 = scmp.ge.s32.totalorder %s1724_s22, 2  ;;  %s1212_s21 = sand.u32 1, %s1704_s17  }
 0x33d   : > { %p2059_p3 = scmp.ne.s32.totalorder %s2051_s29, 0  ;;  %s1213_s20 = scalar_lea.sflag [#allocation6], %s1212_s21 }
 0x33f   : > { %p1548_p5 = pnand %p1553_p1, %p2059_p3 }
 0x341   : > { %1699 = dma.done.wait (!%p1548_p5), %s1213_s20, 32  }
 0x342   : > { %1701 = vsyncadd (!%p1548_p5), %s1213_s20, 4294967264  ;;  %s25_s22 = sadd.s32 1, %s1724_s22   ;;  %s2060_s27 = sld [smem:[#allocation12_spill]] }
 0x343   : > { %p22_p6 = scmp.ge.s32.totalorder %s25_s22, 4   ;;  %s2061_s20 = sld [smem:[#allocation10_spill]] }
 0x344   : > { %s2062_s21 = sld [smem:[#allocation11_spill]]  ;;  %s2063_s17 = smov %s1708_s18 }
 0x345   : > { %s2064_s18 = smov %s1712_s19  ;;  %24 = sbr.rel (!%p22_p6) target bundleno = 5 (0x5), region = 115 }
 0x348   : > { %s2065_s19 = smov %s2060_s27 }
 0x34c   :  { %1218 = vsyncpa [#allocation5], 1 }
 0x34d   :  { %1220 = vsyncpa [#allocation5 + $0x1], 1 }
 0x34e   :  { %1221 = vsyncpa [#allocation6], 1 }
 0x34f   :  { %1223 = vsyncpa [#allocation6 + $0x1], 1 }

</bundles_post_ra>
